<compile_context>
chip_gen: v6e
topology: v6e:2x2x1
jax: 0.10.0
libtpu: 0.0.40
codegen_flags: <defaults>
</compile_context>

<pallas_src>
import functools

import jax
import jax.numpy as jnp
from jax.experimental import pallas as pl
from jax.experimental.pallas import tpu as pltpu

EPS = 1e-5


def _conv_stats_kernel(x_ref, w_ref, y_ref, stats_ref, *, K):
    """Pass 1: Conv1d (single im2col matmul) + per-tile BN partial sums.

    x_ref:     (TN, C_in, L_in)   input tile, L on lanes
    w_ref:     (C_out, K*C_in)    resident weight
    y_ref:     (TN, C_out, L_out) conv output tile, L on lanes
    stats_ref: (1, C_out, 2)      [sum(y), sum(y*y)] over this tile
    """
    TN, _, _ = x_ref.shape
    L_out = y_ref.shape[2]

    x = x_ref[...].astype(jnp.float32)                 # (TN, C_in, L_in)
    w = w_ref[...].astype(jnp.float32)                 # (C_out, K*C_in)

    # im2col: stack the K shifted views along the channel axis so the whole
    # conv is ONE matmul with contraction depth K*C_in (row order k*C_in+ci).
    taps = jnp.concatenate([x[:, :, k:k + L_out] for k in range(K)], axis=1)

    ys = []
    for n in range(TN):                                # TN is small & static
        ys.append(jnp.dot(w, taps[n], preferred_element_type=jnp.float32))
    y = jnp.stack(ys, axis=0)                          # (TN, C_out, L_out)

    y_ref[...] = y.astype(y_ref.dtype)

    # Per-tile BN partial statistics; finalized on the host (tiny reduction).
    s1 = jnp.sum(jnp.sum(y, axis=2, keepdims=True), axis=0, keepdims=True)
    s2 = jnp.sum(jnp.sum(y * y, axis=2, keepdims=True), axis=0, keepdims=True)
    stats_ref[...] = jnp.concatenate([s1, s2], axis=2)  # (1, C_out, 2)


def _bn_relu_kernel(y_ref, scale_ref, shift_ref, o_ref):
    """Pass 2: fused normalize/affine/ReLU epilogue (pure streaming VPU)."""
    y = y_ref[...]
    scale = scale_ref[...][None, :, :]                 # (1, C_out, 1)
    shift = shift_ref[...][None, :, :]
    o_ref[...] = jnp.maximum(y * scale + shift, 0.0).astype(o_ref.dtype)


def _batch_tile(n, cap=8):
    for t in (8, 4, 2, 1):
        if t <= cap and n % t == 0:
            return t
    return 1


def cnn_block(x_ncl, weight, bias, gamma, beta, *, stride=1, padding=0):
    """x_ncl: (N, C_in, L) f32; weight: (C_out, C_in, K). Returns (N, C_out, L_out)."""
    # TODO(synk): stride > 1 and BatchNorm running-stat (running_mean/var) updates
    # are not implemented; this is the training-mode forward only.
    assert stride == 1
    del bias  # per-channel constant added before BN cancels under mean subtraction

    N, C_in, L = x_ncl.shape
    C_out, _, K = weight.shape

    if padding:
        x_ncl = jnp.pad(x_ncl, ((0, 0), (0, 0), (padding, padding)))
        L = L + 2 * padding
    L_out = L - K + 1

    TN = _batch_tile(N)
    num_tiles = N // TN

    # (C_out, C_in, K) -> (C_out, K*C_in), matching the kernel's im2col row order.
    w2 = jnp.transpose(weight, (0, 2, 1)).reshape(C_out, K * C_in).astype(jnp.float32)
    x_ncl = x_ncl.astype(jnp.float32)

    # ---- pass 1: conv + per-tile stats (grid over batch tiles, pipelined) ----
    conv_y, stats = pl.pallas_call(
        functools.partial(_conv_stats_kernel, K=K),
        grid=(num_tiles,),
        in_specs=[
            pl.BlockSpec((TN, C_in, L), lambda i: (i, 0, 0)),
            pl.BlockSpec((C_out, K * C_in), lambda i: (0, 0)),   # resident weight
        ],
        out_specs=[
            pl.BlockSpec((TN, C_out, L_out), lambda i: (i, 0, 0)),
            pl.BlockSpec((1, C_out, 2), lambda i: (i, 0, 0)),
        ],
        out_shape=[
            jax.ShapeDtypeStruct((N, C_out, L_out), jnp.float32),
            jax.ShapeDtypeStruct((num_tiles, C_out, 2), jnp.float32),
        ],
        compiler_params=pltpu.CompilerParams(dimension_semantics=("parallel",)),
    )(x_ncl, w2)

    # ---- host finalize: tiny reduction -> folded per-channel scale/shift ----
    totals = jnp.sum(stats, axis=0)                    # (C_out, 2)
    count = jnp.float32(N * L_out)
    mean = totals[:, 0] / count
    # Biased variance E[y^2]-E[y]^2 (matches BatchNorm1d training).  Clamp
    # guards f32 cancellation for large N*L_out / activation magnitudes.
    var = jnp.maximum(totals[:, 1] / count - mean * mean, 0.0)
    scale = (gamma.astype(jnp.float32) * jax.lax.rsqrt(var + EPS)).reshape(C_out, 1)
    shift = beta.astype(jnp.float32).reshape(C_out, 1) - mean.reshape(C_out, 1) * scale

    # ---- pass 2: normalize + affine + ReLU (streaming, lane-dense) ----
    out = pl.pallas_call(
        _bn_relu_kernel,
        grid=(num_tiles,),
        in_specs=[
            pl.BlockSpec((TN, C_out, L_out), lambda i: (i, 0, 0)),
            pl.BlockSpec((C_out, 1), lambda i: (0, 0)),
            pl.BlockSpec((C_out, 1), lambda i: (0, 0)),
        ],
        out_specs=pl.BlockSpec((TN, C_out, L_out), lambda i: (i, 0, 0)),
        out_shape=jax.ShapeDtypeStruct((N, C_out, L_out), jnp.float32),
        compiler_params=pltpu.CompilerParams(dimension_semantics=("parallel",)),
    )(conv_y, scale, shift)

    return out


def _reference(x_ncl, weight, bias, gamma, beta, *, padding=0):
    """Pure-JAX reference mirroring PyTorch Conv1d + BatchNorm1d(train) + ReLU."""
    if padding:
        x_ncl = jnp.pad(x_ncl, ((0, 0), (0, 0), (padding, padding)))
    y = jax.lax.conv_general_dilated(
        x_ncl, weight, window_strides=(1,), padding="VALID",
        dimension_numbers=("NCH", "OIH", "NCH"))
    y = y + bias.reshape(1, -1, 1)
    mean = jnp.mean(y, axis=(0, 2), keepdims=True)
    var = jnp.mean((y - mean) ** 2, axis=(0, 2), keepdims=True)
    y = (y - mean) * jax.lax.rsqrt(var + EPS)
    y = y * gamma.reshape(1, -1, 1) + beta.reshape(1, -1, 1)
    return jnp.maximum(y, 0.0)


if __name__ == "__main__":
    # Small shapes consistent with the module (spec input is (32, 2, 3000) NCL).
    N, C_in, L = 4, 2, 64
    C_out, K, PAD = 8, 3, 1

    key = jax.random.PRNGKey(0)
    kx, kw, kb, kg, kbe = jax.random.split(key, 5)

    x = jax.random.normal(kx, (N, C_in, L), dtype=jnp.float32)

    bound = 1.0 / (C_in * K) ** 0.5
    weight = jax.random.uniform(kw, (C_out, C_in, K), jnp.float32, -bound, bound)
    bias = jax.random.uniform(kb, (C_out,), jnp.float32, -bound, bound)
    gamma = jax.random.uniform(kg, (C_out,), jnp.float32, 0.5, 1.5)
    beta = 0.1 * jax.random.normal(kbe, (C_out,), dtype=jnp.float32)

    out = cnn_block(x, weight, bias, gamma, beta, padding=PAD)
    out = jax.block_until_ready(out)

    ref = _reference(x, weight, bias, gamma, beta, padding=PAD)
    L_out = L + 2 * PAD - K + 1
    assert out.shape == (N, C_out, L_out), out.shape
    assert jnp.allclose(out, ref, atol=1e-3, rtol=1e-3), \
        f"max abs err {jnp.max(jnp.abs(out - ref))}"

    print("KERNEL_OK")
</pallas_src>

<mosaic_0001>
module attributes {stable_mosaic.version = 11 : i64} {
  func.func @_conv_stats_kernel(%arg0: i32, %arg1: memref<4x2x66xf32, #tpu.memory_space<vmem>>, %arg2: memref<8x6xf32, #tpu.memory_space<vmem>>, %arg3: memref<4x8x64xf32, #tpu.memory_space<vmem>>, %arg4: memref<1x8x2xf32, #tpu.memory_space<vmem>>) attributes {dimension_semantics = [#tpu.dimension_semantics<parallel>], iteration_bounds = array<i64: 1>, scalar_prefetch = 0 : i64, scratch_operands = 0 : i64, tpu.core_type = #tpu.core_type<tc>, window_params = [{transform_indices = @transform_0, window_bounds = array<i64: 4, 2, 66>}, {pipeline_mode = #tpu.pipeline_mode<synchronous>, transform_indices = @transform_1, window_bounds = array<i64: 8, 6>}, {transform_indices = @transform_2, window_bounds = array<i64: 4, 8, 64>}, {transform_indices = @transform_3, window_bounds = array<i64: 1, 8, 2>}]} {
    %c0 = arith.constant 0 : index
    %c0_0 = arith.constant 0 : index
    %c0_1 = arith.constant 0 : index
    %0 = vector.load %arg1[%c0, %c0_0, %c0_1] : memref<4x2x66xf32, #tpu.memory_space<vmem>>, vector<4x2x66xf32>
    %c0_2 = arith.constant 0 : index
    %c0_3 = arith.constant 0 : index
    %1 = vector.load %arg2[%c0_2, %c0_3] : memref<8x6xf32, #tpu.memory_space<vmem>>, vector<8x6xf32>
    %2 = vector.extract_strided_slice %0 {offsets = [0, 0, 0], sizes = [4, 2, 64], strides = [1, 1, 1]} : vector<4x2x66xf32> to vector<4x2x64xf32>
    %3 = vector.extract_strided_slice %0 {offsets = [0, 0, 1], sizes = [4, 2, 64], strides = [1, 1, 1]} : vector<4x2x66xf32> to vector<4x2x64xf32>
    %4 = vector.extract_strided_slice %0 {offsets = [0, 0, 2], sizes = [4, 2, 64], strides = [1, 1, 1]} : vector<4x2x66xf32> to vector<4x2x64xf32>
    %5 = tpu.concatenate %2, %3, %4 in 1 : vector<4x2x64xf32>, vector<4x2x64xf32>, vector<4x2x64xf32> -> vector<4x6x64xf32>
    %6 = vector.extract_strided_slice %5 {offsets = [0, 0, 0], sizes = [1, 6, 64], strides = [1, 1, 1]} : vector<4x6x64xf32> to vector<1x6x64xf32>
    %7 = vector.shape_cast %6 : vector<1x6x64xf32> to vector<6x64xf32>
    %cst = arith.constant dense<0.000000e+00> : vector<8x64xf32>
    %8 = tpu.matmul %1, %7, %cst {dimension_numbers = #tpu.dot_dimension_numbers<[1], [0], [0], [1], [0, 0, 1, 1], [], []>} : vector<8x6xf32>, vector<6x64xf32>, vector<8x64xf32> -> vector<8x64xf32>
    %9 = vector.extract_strided_slice %5 {offsets = [1, 0, 0], sizes = [1, 6, 64], strides = [1, 1, 1]} : vector<4x6x64xf32> to vector<1x6x64xf32>
    %10 = vector.shape_cast %9 : vector<1x6x64xf32> to vector<6x64xf32>
    %cst_4 = arith.constant dense<0.000000e+00> : vector<8x64xf32>
    %11 = tpu.matmul %1, %10, %cst_4 {dimension_numbers = #tpu.dot_dimension_numbers<[1], [0], [0], [1], [0, 0, 1, 1], [], []>} : vector<8x6xf32>, vector<6x64xf32>, vector<8x64xf32> -> vector<8x64xf32>
    %12 = vector.extract_strided_slice %5 {offsets = [2, 0, 0], sizes = [1, 6, 64], strides = [1, 1, 1]} : vector<4x6x64xf32> to vector<1x6x64xf32>
    %13 = vector.shape_cast %12 : vector<1x6x64xf32> to vector<6x64xf32>
    %cst_5 = arith.constant dense<0.000000e+00> : vector<8x64xf32>
    %14 = tpu.matmul %1, %13, %cst_5 {dimension_numbers = #tpu.dot_dimension_numbers<[1], [0], [0], [1], [0, 0, 1, 1], [], []>} : vector<8x6xf32>, vector<6x64xf32>, vector<8x64xf32> -> vector<8x64xf32>
    %15 = vector.extract_strided_slice %5 {offsets = [3, 0, 0], sizes = [1, 6, 64], strides = [1, 1, 1]} : vector<4x6x64xf32> to vector<1x6x64xf32>
    %16 = vector.shape_cast %15 : vector<1x6x64xf32> to vector<6x64xf32>
    %cst_6 = arith.constant dense<0.000000e+00> : vector<8x64xf32>
    %17 = tpu.matmul %1, %16, %cst_6 {dimension_numbers = #tpu.dot_dimension_numbers<[1], [0], [0], [1], [0, 0, 1, 1], [], []>} : vector<8x6xf32>, vector<6x64xf32>, vector<8x64xf32> -> vector<8x64xf32>
    %18 = vector.shape_cast %8 : vector<8x64xf32> to vector<1x8x64xf32>
    %19 = vector.shape_cast %11 : vector<8x64xf32> to vector<1x8x64xf32>
    %20 = vector.shape_cast %14 : vector<8x64xf32> to vector<1x8x64xf32>
    %21 = vector.shape_cast %17 : vector<8x64xf32> to vector<1x8x64xf32>
    %22 = tpu.concatenate %18, %19, %20, %21 in 0 : vector<1x8x64xf32>, vector<1x8x64xf32>, vector<1x8x64xf32>, vector<1x8x64xf32> -> vector<4x8x64xf32>
    %c0_7 = arith.constant 0 : index
    %c0_8 = arith.constant 0 : index
    %c0_9 = arith.constant 0 : index
    %23 = vector.load %arg3[%c0_7, %c0_8, %c0_9] : memref<4x8x64xf32, #tpu.memory_space<vmem>>, vector<4x8x64xf32>
    tpu.vector_store %arg3[%c0_7, %c0_8, %c0_9], %22 {strides = array<i32>} : memref<4x8x64xf32, #tpu.memory_space<vmem>>, vector<4x8x64xf32>,
    %cst_10 = arith.constant dense<0.000000e+00> : vector<4x8xf32>
    %24 = vector.multi_reduction <add>, %22, %cst_10 [2] : vector<4x8x64xf32> to vector<4x8xf32>
    %25 = vector.shape_cast %24 : vector<4x8xf32> to vector<4x8x1xf32>
    %cst_11 = arith.constant dense<0.000000e+00> : vector<8x1xf32>
    %26 = vector.multi_reduction <add>, %25, %cst_11 [0] : vector<4x8x1xf32> to vector<8x1xf32>
    %27 = vector.shape_cast %26 : vector<8x1xf32> to vector<1x8x1xf32>
    %28 = arith.mulf %22, %22 : vector<4x8x64xf32>
    %cst_12 = arith.constant dense<0.000000e+00> : vector<4x8xf32>
    %29 = vector.multi_reduction <add>, %28, %cst_12 [2] : vector<4x8x64xf32> to vector<4x8xf32>
    %30 = vector.shape_cast %29 : vector<4x8xf32> to vector<4x8x1xf32>
    %cst_13 = arith.constant dense<0.000000e+00> : vector<8x1xf32>
    %31 = vector.multi_reduction <add>, %30, %cst_13 [0] : vector<4x8x1xf32> to vector<8x1xf32>
    %32 = vector.shape_cast %31 : vector<8x1xf32> to vector<1x8x1xf32>
    %33 = tpu.concatenate %27, %32 in 2 : vector<1x8x1xf32>, vector<1x8x1xf32> -> vector<1x8x2xf32>
    %c0_14 = arith.constant 0 : index
    %c0_15 = arith.constant 0 : index
    %c0_16 = arith.constant 0 : index
    %34 = vector.load %arg4[%c0_14, %c0_15, %c0_16] : memref<1x8x2xf32, #tpu.memory_space<vmem>>, vector<1x8x2xf32>
    tpu.vector_store %arg4[%c0_14, %c0_15, %c0_16], %33 {strides = array<i32>} : memref<1x8x2xf32, #tpu.memory_space<vmem>>, vector<1x8x2xf32>,
    return
  }
  func.func @transform_0(%arg0: i32) -> (i32, i32, i32) {
    %c0_i32 = arith.constant 0 : i32
    %c0_i32_0 = arith.constant 0 : i32
    %c0_i32_1 = arith.constant 0 : i32
    return %arg0, %c0_i32, %c0_i32_0 : i32, i32, i32
  }
  func.func @transform_1(%arg0: i32) -> (i32, i32) {
    %c0_i32 = arith.constant 0 : i32
    %c0_i32_0 = arith.constant 0 : i32
    %c0_i32_1 = arith.constant 0 : i32
    return %c0_i32, %c0_i32_0 : i32, i32
  }
  func.func @transform_2(%arg0: i32) -> (i32, i32, i32) {
    %c0_i32 = arith.constant 0 : i32
    %c0_i32_0 = arith.constant 0 : i32
    %c0_i32_1 = arith.constant 0 : i32
    return %arg0, %c0_i32, %c0_i32_0 : i32, i32, i32
  }
  func.func @transform_3(%arg0: i32) -> (i32, i32, i32) {
    %c0_i32 = arith.constant 0 : i32
    %c0_i32_0 = arith.constant 0 : i32
    %c0_i32_1 = arith.constant 0 : i32
    return %arg0, %c0_i32, %c0_i32_0 : i32, i32, i32
  }
}

</mosaic_0001>

<bundles_post_ra>
// kernel: tpu_custom_call.1
= control target key start
LH: loop header
LB: loop body
LE: loop exit
PB: predicated region body
PF: predicated region fallthrough
CT: control target
= control target key end

     0   :  { %9 = vsyncpa [#allocation3], 0  ;;  %s641_s0 = inlined_call_operand.hbm [shape: f32[4,2,66], index: 0, kind: input, shape index: {}]   ;;  %s642_s1 = inlined_call_operand.hbm [shape: f32[8,6], index: 1, kind: input, shape index: {}]   ;;  %s643_s2 = inlined_call_operand.hbm [shape: f32[4,8,64], index: 2, kind: output, shape index: {0}]   ;;  %s644_s3 = inlined_call_operand.vmem [shape: f32[1,8,2], index: 3, kind: output, shape index: {1}]  }
   0x1   :  { %10 = vsyncpa [#allocation6], 0 }
   0x2   :  { %11 = vsyncpa [#allocation4], 0  ;;  %s566_s12 = smov [#allocation2]  }
   0x3   :  { %s17_s13 = sshll.u32 %s566_s12, 4  ;;  %s18_s13 = int_to_ptr.vmem [resolvable:$true] %s17_s13 }
   0x4   :  { %s508_s14 = scalar_lea.vmem %s18_s13, 128  ;;  %p513_p1 = scmp.lt.s32.totalorder %s18_s13, %s18_s13 }
   0x5   :  { %p509_p0 = scmp.ne.s32.totalorder %s18_s13, %s508_s14  ;;  %p514_p2 = scmp.lt.s32.totalorder %s508_s14, %s508_s14 }
   0x7   :  { %p515_p3 = por %p514_p2, %p513_p1 }
   0x9   :  { %p516_p4 = pnand %p515_p3, %p509_p0 }
   0xb   :  { %519 = shalt.err (!%p516_p4)
}
   0xc   :  { %s567_s15 = smov 32   ;;  %s568_s16 = smov 2  }
   0xd   :  { %23 = dma.hbm_to_vmem [thread:$0]  %s641_s0, 128, %s18_s13, [#allocation3], %s567_s15, %s567_s15, %s568_s16  }
   0xe   :  { %s569_s19 = smov [#allocation5]  }
   0xf   :  { %s30_s20 = sshll.u32 %s569_s19, 4  ;;  %s31_s20 = int_to_ptr.vmem [resolvable:$true] %s30_s20 }
  0x10   :  { %s528_s21 = scalar_lea.vmem %s31_s20, 128  ;;  %p533_p6 = scmp.lt.s32.totalorder %s31_s20, %s31_s20 }
  0x11   :  { %p529_p5 = scmp.ne.s32.totalorder %s31_s20, %s528_s21  ;;  %p534_p7 = scmp.lt.s32.totalorder %s528_s21, %s528_s21 }
  0x13   :  { %p535_p8 = por %p534_p7, %p533_p6 }
  0x15   :  { %p536_p9 = pnand %p535_p8, %p529_p5 }
  0x17   :  { %539 = shalt.err (!%p536_p9)
}
  0x18   :  { %33 = dma.hbm_to_vmem [thread:$0]  %s642_s1, 128, %s31_s20, [#allocation6]  }
  0x19   :  { %560 = dma.done.wait [#allocation3], 128  }
  0x1a   :  { %561 = vsyncadd [#allocation3], 4294967168 }
  0x1b   :  { %562 = dma.done.wait [#allocation6], 128  }
  0x1c   :  { %563 = vsyncadd [#allocation6], 4294967168  ;;  %v570_v0 = vmov 0.0   ;;  %vm571_vm0 = vmmov 0   ;;  %v41_v1 = vld [vmem:[#allocation2 + $0x2] sm:$0x3] }
  0x1d   :  { %469 = vmatprep.subr.mxu0 %v570_v0  ;;  %474 = vmatprep.subr.mxu1 %v570_v0  ;;  %v40_v2 = vld [vmem:[#allocation2] sm:$0x3]  ;;  %v50_v3 = vrot.slane %v41_v1, 6  ;;  %s572_s0 = smov 127   ;;  %v66_v5 = vrot.slane %v41_v1, 4  ;;  %s573_s1 = smov 126  }
  0x1e   :  { %471 = vmatprep.mubr.msk.f32.mxu0 %vm571_vm0, %v570_v0  ;;  %476 = vmatprep.mubr.msk.f32.mxu1 %vm571_vm0, %v570_v0  ;;  %v49_v4 = vrot.slane %v40_v2, 6  ;;  %v65_v6 = vrot.slane %v40_v2, 4  ;;  %v42_v7 = vld [vmem:[#allocation2 + $0x4] sm:$0x3]  ;;  %v43_v10 = vld [vmem:[#allocation2 + $0x6] sm:$0x3] }
  0x1f   :  { %55 = vrot.lane.b32.xlu1 %v50_v3, %s572_s0  ;;  %v51_v8 = vrot.slane %v42_v7, 6  ;;  %v67_v9 = vrot.slane %v42_v7, 4  ;;  %v52_v11 = vrot.slane %v43_v10, 6  ;;  %v68_v12 = vrot.slane %v43_v10, 4  ;;  %v44_v19 = vld [vmem:[#allocation5] sm:$0xff]  ;;  %s574_s24 = smov [#allocation7]  }
  0x20   :  { %53 = vrot.lane.b32.xlu0 %v49_v4, %s572_s0  ;;  %vm81_vm1 = vcmask 1041408   ;;  %vm86_vm2 = vcmask 1043456   ;;  %vm95_vm3 = vcmask 1045504   ;;  %vm91_vm4 = vcmask 48128   ;;  %s436_s25 = sshll.u32 %s574_s24, 4  ;;  %s437_s25 = int_to_ptr.vmem [resolvable:$true] %s436_s25 }
  0x21   :  { %vm388_vm5 = vcmask 523264   ;;  %s540_s26 = scalar_lea.vmem %s437_s25, 512  ;;  %p545_p11 = scmp.lt.s32.totalorder %s437_s25, %s437_s25 }
  0x22   :  { %p541_p10 = scmp.ne.s32.totalorder %s437_s25, %s540_s26  ;;  %p546_p12 = scmp.lt.s32.totalorder %s540_s26, %s540_s26 }
  0x23   :  { %71 = vrot.lane.b32.xlu1 %v66_v5, %s573_s1 }
  0x24   :  { %69 = vrot.lane.b32.xlu0 %v65_v6, %s573_s1  ;;  %p547_p13 = por %p546_p12, %p545_p11 }
  0x26   :  { %p548_p0 = pnand %p547_p13, %p541_p10 }
  0x27   :  { %73 = vrot.lane.b32.xlu1 %v67_v9, %s573_s1 }
  0x28   :  { %57 = vrot.lane.b32.xlu0 %v51_v8, %s572_s0 }
  0x2b   :  { %75 = vrot.lane.b32.xlu1 %v68_v12, %s573_s1 }
  0x2c   :  { %59 = vrot.lane.b32.xlu0 %v52_v11, %s572_s0 }
  0x91   :  { %v56_v13 = vpop.permute.xlu1 %55 }
  0x92   :  { %v54_v14 = vpop.permute.xlu0 %53  ;;  %v83_v15 = vsel %vm81_vm1, %v41_v1, %v56_v13 }
  0x93   :  { %v82_v16 = vsel %vm81_vm1, %v40_v2, %v54_v14 }
  0x95   :  { %v72_v17 = vpop.permute.xlu1 %71 }
  0x96   :  { %v70_v18 = vpop.permute.xlu0 %69  ;;  %v88_v21 = vsel %vm86_vm2, %v83_v15, %v72_v17 }
  0x97   :  { %v87_v20 = vsel %vm86_vm2, %v82_v16, %v70_v18  ;;  %475 = vmatpush3.msk.msra.mxu1 %vm95_vm3, %v88_v21 }
  0x98   :  { %470 = vmatpush3.msk.msra.mxu0 %vm95_vm3, %v87_v20  ;;  %477 = vmatmul.mubr.msk.f32.vlgmr.msra.gmra.mxu1 %vm91_vm4, %v44_v19 }
  0x99   :  { %472 = vmatmul.mubr.msk.f32.vlgmr.msra.gmra.mxu0 %vm91_vm4, %v44_v19  ;;  %v74_v23 = vpop.permute.xlu1 %73  ;;  %479 = vmatprep.subr.mxu0 %v570_v0 }
  0x9a   :  { %v58_v22 = vpop.permute.xlu0 %57  ;;  %481 = vmatprep.mubr.msk.f32.mxu0 %vm571_vm0, %v570_v0  ;;  %484 = vmatprep.subr.mxu1 %v570_v0 }
  0x9b   :  { %v84_v24 = vsel %vm81_vm1, %v42_v7, %v58_v22  ;;  %486 = vmatprep.mubr.msk.f32.mxu1 %vm571_vm0, %v570_v0 }
  0x9c   :  { %v89_v25 = vsel %vm86_vm2, %v84_v24, %v74_v23 }
  0x9d   :  { %480 = vmatpush3.msk.msra.mxu0 %vm95_vm3, %v89_v25  ;;  %v76_v27 = vpop.permute.xlu1 %75 }
  0x9e   :  { %482 = vmatmul.mubr.msk.f32.vlgmr.msra.gmra.mxu0 %vm91_vm4, %v44_v19  ;;  %v60_v26 = vpop.permute.xlu0 %59 }
  0x9f   :  { %v85_v28 = vsel %vm81_vm1, %v43_v10, %v60_v26 }
  0xa0   :  { %v90_v29 = vsel %vm86_vm2, %v85_v28, %v76_v27 }
  0xa1   :  { %485 = vmatpush3.msk.msra.mxu1 %vm95_vm3, %v90_v29 }
  0xa2   :  { %487 = vmatmul.mubr.msk.f32.vlgmr.msra.gmra.mxu1 %vm91_vm4, %v44_v19 }
 0x158   :  { %v238_v31 = vpop.f32.mrf.mxu1 }
 0x159   :  { %v165_v30 = vpop.f32.mrf.mxu0  ;;  %390 = vst.msk [vmem:[#allocation7 + $0x8] sm:$0xff] %vm388_vm5, %v238_v31  ;;  %v396_v32 = vsel %vm388_vm5, %v238_v31, 0.0  ;;  %v409_v37 = vmul.f32 %v238_v31, %v238_v31 }
 0x15a   :  { %389 = vst.msk [vmem:[#allocation7] sm:$0xff] %vm388_vm5, %v165_v30  ;;  %v393_v33 = vsel %vm388_vm5, %v165_v30, 0.0  ;;  %v408_v34 = vmul.f32 %v165_v30, %v165_v30  ;;  %397 = vadd.xlane.f32.xlu1 %v396_v32  ;;  %v478_v36 = vpop.f32.mrf.mxu1 }
 0x15b   :  { %394 = vadd.xlane.f32.xlu0 %v393_v33  ;;  %v473_v35 = vpop.f32.mrf.mxu0  ;;  %v415_v41 = vsel %vm388_vm5, %v409_v37, 0.0 }
 0x15c   :  { %v412_v39 = vsel %vm388_vm5, %v408_v34, 0.0 }
 0x15e   :  { %v311_v38 = vpop.f32.mrf.mxu0 }
 0x15f   :  { %391 = vst.msk [vmem:[#allocation7 + $0x10] sm:$0xff] %vm388_vm5, %v311_v38  ;;  %413 = vadd.xlane.f32.xlu0 %v412_v39  ;;  %v399_v40 = vsel %vm388_vm5, %v311_v38, 0.0  ;;  %v410_v43 = vmul.f32 %v311_v38, %v311_v38 }
 0x160   :  { %400 = vadd.xlane.f32.xlu1 %v399_v40  ;;  %v483_v42 = vpop.f32.mrf.mxu0 }
 0x161   :  { %v418_v46 = vsel %vm388_vm5, %v410_v43, 0.0 }
 0x162   :  { %v384_v44 = vpop.f32.mrf.mxu1 }
 0x163   :  { %392 = vst.msk [vmem:[#allocation7 + $0x18] sm:$0xff] %vm388_vm5, %v384_v44  ;;  %416 = vadd.xlane.f32.xlu0 %v415_v41  ;;  %v402_v45 = vsel %vm388_vm5, %v384_v44, 0.0  ;;  %v411_v48 = vmul.f32 %v384_v44, %v384_v44 }
 0x164   :  { %403 = vadd.xlane.f32.xlu1 %v402_v45  ;;  %v488_v47 = vpop.f32.mrf.mxu1 }
 0x165   :  { %v421_v49 = vsel %vm388_vm5, %v411_v48, 0.0 }
 0x167   :  { %419 = vadd.xlane.f32.xlu0 %v418_v46 }
 0x16b   :  { %422 = vadd.xlane.f32.xlu0 %v421_v49 }
 0x16c   :  { %551 = shalt.err (!%p548_p0)
}
 0x16d   :  { %s575_s27 = smov 128   ;;  %s576_s28 = smov 8   ;;  %vm427_vm6 = vcmask 7168   ;;  %vm429_vm7 = vcmask 15360  }
 0x16e   :  { %442 = dma.vmem_to_hbm [thread:$0]  %s437_s25, 512, %s643_s2, [#allocation4], %s575_s27, %s575_s27, %s576_s28  }
 0x1e3   :  { %v398_v51 = vpop.xlane.xlu1 %397 }
 0x1e4   :  { %v395_v50 = vpop.xlane.xlu0 %394 }
 0x1e5   :  { %v405_v56 = vadd.f32 %v398_v51, %v395_v50 }
 0x1e8   :  { %v414_v52 = vpop.xlane.xlu0 %413 }
 0x1e9   :  { %v401_v53 = vpop.xlane.xlu1 %400 }
 0x1ea   :  { %v406_v59 = vadd.f32 %v405_v56, %v401_v53 }
 0x1ec   :  { %v417_v54 = vpop.xlane.xlu0 %416 }
 0x1ed   :  { %v424_v57 = vadd.f32 %v417_v54, %v414_v52  ;;  %v404_v58 = vpop.xlane.xlu1 %403 }
 0x1ee   :  { %v407_v62 = vadd.f32 %v406_v59, %v404_v58 }
 0x1f0   :  { %v420_v55 = vpop.xlane.xlu0 %419 }
 0x1f1   :  { %v425_v60 = vadd.f32 %v424_v57, %v420_v55 }
 0x1f4   :  { %v423_v61 = vpop.xlane.xlu0 %422 }
 0x1f5   :  { %v426_v63 = vadd.f32 %v425_v60, %v423_v61 }
 0x1f7   :  { %v428_v0 = vsel %vm427_vm6, %v407_v62, %v426_v63 }
 0x1f8   :  { %430 = vst.msk [vmem:[%s644_s3] sm:$0xff] %vm429_vm7, %v428_v0 }
 0x1f9   :  { %564 = dma.done.wait [#allocation4], 512  }
 0x1fa   :  { %565 = vsyncadd [#allocation4], 4294966784 }
 0x1fb   :  { %450 = vsyncpa [#allocation3], 1 }
 0x1fc   :  { %451 = vsyncpa [#allocation6], 1 }
 0x1fd   :  { %452 = vsyncpa [#allocation4], 1 }

</bundles_post_ra>
